<compile_context>
chip_gen: v7x
topology: tpu7x:2x2x1
jax: 0.10.0
libtpu: 0.0.40
codegen_flags: <defaults>
</compile_context>

<pallas_src>
import functools

import jax
import jax.numpy as jnp
from jax.experimental import pallas as pl
from jax.experimental.pallas import tpu as pltpu


def _round_up(x, m):
    return ((x + m - 1) // m) * m


def _cdiv(a, b):
    return (a + b - 1) // b


@functools.lru_cache(maxsize=1)
def _tpu_params():
    """(tensorcores_per_chip, physical_vmem_bytes) for the local TPU."""
    num_tc, vmem = 1, 64 << 20                 # conservative defaults
    try:
        kind = jax.devices()[0].device_kind.lower()
    except Exception:
        kind = ""
    if "v7" in kind:
        num_tc, vmem = 2, 64 << 20
    elif "v5" in kind or "v6" in kind:
        num_tc, vmem = 1, 128 << 20
    try:                                        # authoritative when available
        vmem = int(pltpu.get_tpu_info().vmem_capacity_bytes)
    except Exception:
        pass
    return num_tc, vmem


# ----------------------------------------------------------------------------
# Kernels
# ----------------------------------------------------------------------------
def _linear_kernel_fused(x_ref, w_ref, b_ref, o_ref):
    """k_steps == 1 (common classifier case): direct dot + bias store."""
    o_ref[...] = (jnp.dot(x_ref[...], w_ref[...],
                          preferred_element_type=jnp.float32)
                  + b_ref[...]).astype(o_ref.dtype)


def _linear_kernel_acc(x_ref, w_ref, b_ref, o_ref, acc_ref):
    """K-split case (huge feature_dim): f32 accumulator, bias folded at k==0."""
    k = pl.program_id(2)
    part = jnp.dot(x_ref[...], w_ref[...], preferred_element_type=jnp.float32)

    @pl.when(k == 0)
    def _init():                       # no zero-fill pass; bias folded in
        acc_ref[...] = part + b_ref[...]

    @pl.when(k > 0)
    def _accum():
        acc_ref[...] += part

    @pl.when(k == pl.num_programs(2) - 1)
    def _store():
        o_ref[...] = acc_ref[...].astype(o_ref.dtype)


def _vmem_footprint_bytes(tile_b, tile_k, tile_n, k_steps, in_bytes):
    return (2 * tile_b * tile_k * in_bytes          # x, double-buffered
            + 2 * tile_k * tile_n * in_bytes        # weight, double-buffered
            + 2 * 8 * tile_n * 4                    # bias (sublane-padded)
            + 2 * tile_b * tile_n * 4               # out, double-buffered
            + (tile_b * tile_n * 4 if k_steps > 1 else 0))  # accumulator


# ----------------------------------------------------------------------------
# Wrapper
# ----------------------------------------------------------------------------
@functools.partial(jax.jit, static_argnames=("use_bf16",))
def da_linear_forward(x, w, b, *, use_bf16=False):
    """out = x @ w + b via Pallas. x:(B,F), w:(F,C), b:(C,) or (1,C)."""
    compute_dtype = jnp.bfloat16 if use_bf16 else jnp.float32
    x = x.astype(compute_dtype)        # single cast, no f32 round trip
    w = w.astype(compute_dtype)
    b = jnp.reshape(b, (1, -1)).astype(jnp.float32)

    B, F = x.shape
    C = w.shape[1]
    num_tc, vmem_phys = _tpu_params()
    big_vmem = vmem_phys >= (96 << 20)

    in_bytes = 2 if use_bf16 else 4
    sub = 16 if use_bf16 else 8        # sublane granule of the operand dtype

    # ---- class (N) axis: lane-dense, padded to a multiple of 128 -----------
    c_pad = _round_up(C, 128)
    tile_n = c_pad if c_pad <= 512 else 256   # wide heads get an N grid axis

    # ---- feature (K) axis: whole weight VMEM-resident when it fits ---------
    max_tile_k = 8192 if big_vmem else 4096
    if F <= max_tile_k:
        tile_k, f_pad = F, F                  # k_steps == 1, no feature pad
    else:
        tile_k = 2048
        f_pad = _round_up(F, tile_k)
    k_steps = f_pad // tile_k

    # ---- batch (M) axis -----------------------------------------------------
    b_pad = _round_up(B, sub)                 # at most sub-1 padded rows
    target_b = 1024 if big_vmem else 512
    tile_b = min(target_b, b_pad)
    if num_tc == 2 and b_pad >= 2 * sub:
        # Give each of the two TensorCores at least one batch tile.
        # TODO(synk): if profiling shows "parallel" does not shard the batch
        # axis across v7x's 2 TCs, switch it to pltpu.CORE_PARALLEL.
        tile_b = min(tile_b, _round_up(_cdiv(b_pad, 2), sub))

    # ---- VMEM budget: shrink in preference order until the tiles fit -------
    vmem_budget = (80 << 20) if big_vmem else (40 << 20)

    def _fits():
        return _vmem_footprint_bytes(tile_b, tile_k, tile_n, k_steps,
                                     in_bytes) <= vmem_budget

    while not _fits() and tile_b > max(256, sub):
        tile_b = max(sub, _round_up(tile_b // 2, sub))
    while not _fits() and tile_n > 128:
        tile_n = max(128, _round_up(tile_n // 2, 128))
    while not _fits() and tile_k > 512:
        tile_k = max(512, _round_up(tile_k // 2, 128))
        f_pad = _round_up(F, tile_k)
        k_steps = f_pad // tile_k
    while not _fits() and tile_b > sub:
        tile_b = max(sub, _round_up(tile_b // 2, sub))

    b_steps = _cdiv(b_pad, tile_b)
    n_steps = _cdiv(c_pad, tile_n)

    # ---- layout plumbing (only when actually required) ---------------------
    if b_pad != B or f_pad != F:
        x = jnp.pad(x, ((0, b_pad - B), (0, f_pad - F)))
    if f_pad != F or c_pad != C:
        w = jnp.pad(w, ((0, f_pad - F), (0, c_pad - C)))
    if c_pad != C:
        b = jnp.pad(b, ((0, 0), (0, c_pad - C)))

    footprint = _vmem_footprint_bytes(tile_b, tile_k, tile_n, k_steps, in_bytes)
    vmem_limit = min(max(32 << 20, int(1.5 * footprint) + (4 << 20)),
                     (vmem_phys * 3) // 4)

    if k_steps == 1:
        kernel = _linear_kernel_fused
        scratch_shapes = []
    else:
        kernel = _linear_kernel_acc
        scratch_shapes = [pltpu.VMEM((tile_b, tile_n), jnp.float32)]

    out = pl.pallas_call(
        kernel,
        out_shape=jax.ShapeDtypeStruct((b_pad, c_pad), jnp.float32),
        grid_spec=pltpu.PrefetchScalarGridSpec(
            num_scalar_prefetch=0,
            grid=(b_steps, n_steps, k_steps),
            in_specs=[
                pl.BlockSpec((tile_b, tile_k), lambda i, j, k: (i, k)),
                pl.BlockSpec((tile_k, tile_n), lambda i, j, k: (k, j)),
                pl.BlockSpec((1, tile_n), lambda i, j, k: (0, j)),
            ],
            out_specs=pl.BlockSpec((tile_b, tile_n), lambda i, j, k: (i, j)),
            scratch_shapes=scratch_shapes,
        ),
        compiler_params=pltpu.CompilerParams(
            dimension_semantics=("parallel", "parallel", "arbitrary"),
            vmem_limit_bytes=vmem_limit),
    )(x, w, b)

    if b_pad != B or c_pad != C:
        out = out[:B, :C]
    return out


# ----------------------------------------------------------------------------
# Module
# ----------------------------------------------------------------------------
class DALinearClassifier:
    """JAX/Pallas port of the PyTorch DALinearClassifier (forward pass)."""

    # Below this many MACs, plain XLA beats the pallas_call fixed cost.
    _PALLAS_MIN_WORK = 1 << 18

    def __init__(self, feature_dim, num_class, c=1.0, lam=1.0, key=None):
        self.feature_dim = feature_dim
        self.num_class = num_class
        self.c = c
        self.lam = lam
        if key is None:
            key = jax.random.PRNGKey(0)
        kw, kb = jax.random.split(key)
        bound = 1.0 / (feature_dim ** 0.5)
        # Stored as (F, C) == PyTorch weight (C, F) transposed.
        self.weight = jax.random.uniform(
            kw, (feature_dim, num_class), jnp.float32, -bound, bound)
        self.bias = jax.random.uniform(
            kb, (1, num_class), jnp.float32, -bound, bound)
        # Pre-pad once (lane-dense columns) so the per-call forward does not
        # re-copy the weight/bias in HBM on every invocation.
        c_pad = _round_up(num_class, 128)
        self._weight_padded = jnp.pad(
            self.weight, ((0, 0), (0, c_pad - num_class)))
        self._bias_padded = jnp.pad(
            self.bias, ((0, 0), (0, c_pad - num_class)))
        self.training = False

    def _head(self, x):
        # TODO(synk): stands in for .double(); f64 is unavailable on TPU.
        x = x.astype(jnp.float32)
        B, F = x.shape
        if B * F * self.num_class < self._PALLAS_MIN_WORK:
            # Tiny problem: let XLA fuse it; the Pallas kernel would be slower.
            return x @ self.weight + self.bias
        out = da_linear_forward(x, self._weight_padded, self._bias_padded)
        return out[:, :self.num_class]

    def __call__(self, *args):
        if self.training:
            data_s, data_t, label_s = args
            out_s = self._head(data_s)
            out_t = self._head(data_t)
            # TODO(synk): DAOutput's c/lam domain-adaptation objective is not
            # reproducible from the reference snippet; returning linear heads.
            return out_s, out_t
        data_t = args[0]
        return self._head(data_t)


if __name__ == "__main__":
    key = jax.random.PRNGKey(0)
    k_model, k_s, k_t = jax.random.split(key, 3)

    feature_dim, num_class, batch = 32, 8, 16
    model = DALinearClassifier(feature_dim, num_class, c=1.0, lam=0.1,
                               key=k_model)
    data_t = jax.random.normal(k_t, (batch, feature_dim), jnp.float32)
    ref = data_t @ model.weight + model.bias

    # Run the Pallas kernel directly (forced even at demo size) and check.
    out = jax.block_until_ready(
        da_linear_forward(data_t, model.weight, model.bias))
    assert out.shape == (batch, num_class)
    assert jnp.allclose(out, ref, atol=1e-5, rtol=1e-5)

    # bf16-operand path (halves x HBM traffic), f32 accumulation.
    out_bf16 = jax.block_until_ready(
        da_linear_forward(data_t, model.weight, model.bias, use_bf16=True))
    assert out_bf16.shape == (batch, num_class)
    assert jnp.allclose(out_bf16, ref, atol=5e-2, rtol=5e-2)

    # Module-level eval path (size-based dispatch) and training smoke test.
    out_m = jax.block_until_ready(model(data_t))
    assert out_m.shape == (batch, num_class)
    assert jnp.allclose(out_m, ref, atol=1e-5, rtol=1e-5)

    model.training = True
    data_s = jax.random.normal(k_s, (batch, feature_dim), jnp.float32)
    label_s = jnp.zeros((batch,), jnp.int32)
    out_s, out_t = model(data_s, data_t, label_s)
    jax.block_until_ready((out_s, out_t))
    assert out_s.shape == (batch, num_class)
    assert out_t.shape == (batch, num_class)

    print("KERNEL_OK")
</pallas_src>

<mosaic_0001>
module attributes {stable_mosaic.version = 11 : i64} {
  func.func @_linear_kernel_fused(%arg0: i32, %arg1: i32, %arg2: i32, %arg3: memref<16x32xf32, #tpu.memory_space<vmem>>, %arg4: memref<32x128xf32, #tpu.memory_space<vmem>>, %arg5: memref<1x128xf32, #tpu.memory_space<vmem>>, %arg6: memref<16x128xf32, #tpu.memory_space<vmem>>) attributes {dimension_semantics = [#tpu.dimension_semantics<parallel>, #tpu.dimension_semantics<parallel>, #tpu.dimension_semantics<arbitrary>], iteration_bounds = array<i64: 1, 1, 1>, scalar_prefetch = 0 : i64, scratch_operands = 0 : i64, tpu.core_type = #tpu.core_type<tc>, window_params = [{transform_indices = @transform_0, window_bounds = array<i64: 16, 32>}, {transform_indices = @transform_1, window_bounds = array<i64: 32, 128>}, {transform_indices = @transform_2, window_bounds = array<i64: 1, 128>}, {transform_indices = @transform_3, window_bounds = array<i64: 16, 128>}]} {
    %c0 = arith.constant 0 : index
    %c0_0 = arith.constant 0 : index
    %0 = vector.load %arg3[%c0, %c0_0] : memref<16x32xf32, #tpu.memory_space<vmem>>, vector<16x32xf32>
    %c0_1 = arith.constant 0 : index
    %c0_2 = arith.constant 0 : index
    %1 = vector.load %arg4[%c0_1, %c0_2] : memref<32x128xf32, #tpu.memory_space<vmem>>, vector<32x128xf32>
    %cst = arith.constant dense<0.000000e+00> : vector<16x128xf32>
    %2 = tpu.matmul %0, %1, %cst {dimension_numbers = #tpu.dot_dimension_numbers<[1], [0], [0], [1], [0, 0, 1, 1], [], []>} : vector<16x32xf32>, vector<32x128xf32>, vector<16x128xf32> -> vector<16x128xf32>
    %c0_3 = arith.constant 0 : index
    %c0_4 = arith.constant 0 : index
    %3 = vector.load %arg5[%c0_3, %c0_4] : memref<1x128xf32, #tpu.memory_space<vmem>>, vector<1x128xf32>
    %4 = vector.broadcast %3 : vector<1x128xf32> to vector<16x128xf32>
    %5 = arith.addf %2, %4 : vector<16x128xf32>
    %c0_5 = arith.constant 0 : index
    %c0_6 = arith.constant 0 : index
    %6 = vector.load %arg6[%c0_5, %c0_6] : memref<16x128xf32, #tpu.memory_space<vmem>>, vector<16x128xf32>
    tpu.vector_store %arg6[%c0_5, %c0_6], %5 {strides = array<i32>} : memref<16x128xf32, #tpu.memory_space<vmem>>, vector<16x128xf32>,
    return
  }
  func.func @transform_0(%arg0: i32, %arg1: i32, %arg2: i32) -> (i32, i32) {
    %c0_i32 = arith.constant 0 : i32
    return %arg0, %arg2 : i32, i32
  }
  func.func @transform_1(%arg0: i32, %arg1: i32, %arg2: i32) -> (i32, i32) {
    %c0_i32 = arith.constant 0 : i32
    return %arg2, %arg1 : i32, i32
  }
  func.func @transform_2(%arg0: i32, %arg1: i32, %arg2: i32) -> (i32, i32) {
    %c0_i32 = arith.constant 0 : i32
    %c0_i32_0 = arith.constant 0 : i32
    return %c0_i32, %arg1 : i32, i32
  }
  func.func @transform_3(%arg0: i32, %arg1: i32, %arg2: i32) -> (i32, i32) {
    %c0_i32 = arith.constant 0 : i32
    return %arg0, %arg1 : i32, i32
  }
}

</mosaic_0001>

<bundles_post_ra>
// kernel: da_linear_forward.1
= control target key start
LH: loop header
LB: loop body
LE: loop exit
PB: predicated region body
PF: predicated region fallthrough
CT: control target
= control target key end

     0   :  { %vm27_vm0 = vcmask 261120   ;;  %s190_s1 = inlined_call_operand.vmem [shape: f32[32,128], index: 1, kind: input, shape index: {}]   ;;  %s191_s0 = inlined_call_operand.vmem [shape: f32[16,32], index: 0, kind: input, shape index: {}]   ;;  %s192_s2 = inlined_call_operand.vmem [shape: f32[1,128], index: 2, kind: input, shape index: {}]   ;;  %s193_s3 = inlined_call_operand.vmem [shape: f32[16,128], index: 3, kind: output, shape index: {}]  }
   0x1   :  { %v16_v0 = vld [vmem:[%s190_s1] sm:$0xff]  ;;  %v17_v1 = vld [vmem:[%s190_s1 + $0x8] sm:$0xff]  ;;  %v18_v2 = vld [vmem:[%s190_s1 + $0x10] sm:$0xff] }
   0x2   :  { %v135_v3 = vpack.c.bf16 %v17_v1, %v16_v0  ;;  %v19_v4 = vld [vmem:[%s190_s1 + $0x18] sm:$0xff]  ;;  %v14_v5 = vld [vmem:[%s191_s0] sm:$0xff]  ;;  %v15_v7 = vld [vmem:[%s191_s0 + $0x8] sm:$0xff] }
   0x3   :  { %v139_v6 = vpack.c.bf16 %v19_v4, %v18_v2  ;;  %132 = vmatprep.mubr.msk.f32.mxu0 %vm27_vm0, %v14_v5  ;;  %v115_v8 = vld [vmem:[%s192_s2] ss:$0 sm:$0xff] }
   0x4   :  { %136 = vmatprep.subr.bf16.mxu0 %v135_v3 }
   0x5   :  { %138 = vmatpush3.bf16.msra.mxu0 %v135_v3 }
   0x6   :  { %140 = vmatprep.subr.bf16.mxu0 %v139_v6 }
   0x9   :  { %142 = vmatpush3.bf16.msra.mxu0 %v139_v6 }
   0xc   :  { %133 = vmatmul.mubr.msk.f32.vlgmr.msra.gmra.mrb[0].mxu0 %vm27_vm0, %v15_v7 }
  0xdf   :  { %v134_v9 = vpop.f32.mrb[0].mxu0 }
  0xe0   :  { %v106_v10 = vadd.f32 %v134_v9, %v115_v8  ;;  %v100_v11 = vpop.f32.mrb[1].mxu0 }
  0xe1   :  { %v101_v12 = vadd.f32 %v115_v8, %v100_v11 }
  0xe2   :  { %110 = vst [vmem:[%s193_s3 + $0x8] sm:$0xff] %v106_v10 }
  0xe3   :  { %109 = vst [vmem:[%s193_s3] sm:$0xff] %v101_v12 }

</bundles_post_ra>
